<compile_context>
chip_gen: v7x
topology: tpu7x:2x2x1
jax: 0.10.0
libtpu: 0.0.40
codegen_flags: <defaults>
</compile_context>

<pallas_src>
import functools
import math

import jax
import jax.numpy as jnp
from jax.experimental import pallas as pl
from jax.experimental.pallas import tpu as pltpu

_NEG_INF = -(2.0 ** 32) + 1.0  # matches MY_INF = 2**32 ; padding value = -MY_INF + 1


def _self_attention_kernel(q_ref, k_ref, v_ref, kmask_ref, o_ref, *,
                           scale, causal, block_q):
    q = q_ref[...]                       # (block_q, D)
    k = k_ref[...]                       # (Lk, D)
    v = v_ref[...]                       # (Lk, Dv)

    # scores = Q @ K^T on the MXU (native-dtype operands, f32 accumulation)
    s = jax.lax.dot_general(q, k, (((1,), (1,)), ((), ())),
                            preferred_element_type=jnp.float32)   # (block_q, Lk)
    s = s * scale

    neg = jnp.float32(_NEG_INF)

    # key padding mask: keys whose feature-sum is zero get the huge-negative score
    kmask = kmask_ref[...]               # (1, Lk) f32, 1.0 = valid key, 0.0 = padding
    s = jnp.where(kmask == 0.0, neg, s)

    if causal:
        qi = pl.program_id(1)
        row = qi * block_q + jax.lax.broadcasted_iota(jnp.int32, s.shape, 0)
        col = jax.lax.broadcasted_iota(jnp.int32, s.shape, 1)
        s = jnp.where(col > row, neg, s)

    # softmax over keys (f32)
    m = jnp.max(s, axis=-1, keepdims=True)
    p = jnp.exp(s - m)
    l = jnp.sum(p, axis=-1, keepdims=True)
    p = p / l

    # TODO(synk): dropout (p=0.1) is treated as identity (inference mode).

    # attn @ V (cast probabilities to V's dtype so bf16 V keeps bf16 MXU throughput)
    o = jnp.dot(p.astype(v.dtype), v, preferred_element_type=jnp.float32)
    o_ref[...] = o.astype(o_ref.dtype)


def self_attention_pallas(Q, K, V, attn_mask=False, *, block_q=128):
    """Q: (B, Lq, D), K: (B, Lk, D), V: (B, Lk, Dv) -> (B, Lq, Dv)."""
    B, Lq, D = Q.shape
    Bk, Lk, Dk = K.shape
    Bv, Lkv, Dv = V.shape
    assert B == Bk == Bv and D == Dk and Lk == Lkv

    block_q = min(block_q, Lq)
    if block_q < Lq and block_q % 8 != 0:
        block_q = max(8, (block_q // 8) * 8)   # keep the row tile sublane-aligned

    # key_masks = sign(|sum_d K|): 1.0 for real keys, 0.0 for all-zero (padding) keys.
    kmask = jnp.sign(jnp.abs(jnp.sum(K.astype(jnp.float32), axis=-1)))  # (B, Lk)
    kmask = kmask[:, None, :]                                           # (B, 1, Lk)

    grid = (B, pl.cdiv(Lq, block_q))

    kernel = functools.partial(
        _self_attention_kernel,
        scale=1.0 / math.sqrt(D),
        causal=bool(attn_mask),
        block_q=block_q,
    )

    out = pl.pallas_call(
        kernel,
        out_shape=jax.ShapeDtypeStruct((B, Lq, Dv), Q.dtype),
        grid_spec=pltpu.PrefetchScalarGridSpec(
            num_scalar_prefetch=0,
            grid=grid,
            in_specs=[
                pl.BlockSpec((None, block_q, D), lambda b, i: (b, i, 0)),  # Q tile
                pl.BlockSpec((None, Lk, D),      lambda b, i: (b, 0, 0)),  # K (whole, per batch)
                pl.BlockSpec((None, Lk, Dv),     lambda b, i: (b, 0, 0)),  # V (whole, per batch)
                pl.BlockSpec((None, 1, Lk),      lambda b, i: (b, 0, 0)),  # key-padding mask
            ],
            out_specs=pl.BlockSpec((None, block_q, Dv), lambda b, i: (b, i, 0)),
        ),
        compiler_params=pltpu.CompilerParams(
            dimension_semantics=("parallel", "parallel"),
            vmem_limit_bytes=32 * 1024 * 1024,
        ),
    )(Q, K, V, kmask)
    return out


def _reference(Q, K, V, attn_mask=False):
    """Pure-JAX reference with the exact PyTorch-module semantics."""
    d = Q.shape[-1]
    s = jnp.einsum('bqd,bkd->bqk', Q, K,
                   precision=jax.lax.Precision.HIGHEST) / math.sqrt(d)
    key_masks = jnp.sign(jnp.abs(jnp.sum(K, axis=-1)))[:, None, :]      # (B, 1, Lk)
    cond = (key_masks == 0.0).astype(s.dtype)
    s = _NEG_INF * cond + s * (1.0 - cond)
    if attn_mask:
        tril = jnp.tril(jnp.ones((s.shape[1], s.shape[2]), s.dtype))
        cond2 = (tril == 0.0).astype(s.dtype)[None]
        s = _NEG_INF * cond2 + s * (1.0 - cond2)
    p = jax.nn.softmax(s, axis=-1)
    return jnp.einsum('bqk,bkd->bqd', p, V,
                      precision=jax.lax.Precision.HIGHEST)


if __name__ == "__main__":
    B, Lq, Lk, D, Dv = 2, 128, 128, 128, 128   # lane-dense (multiples of 128)

    key = jax.random.PRNGKey(0)
    kq, kk, kv = jax.random.split(key, 3)
    Q = jax.random.normal(kq, (B, Lq, D), jnp.float32)
    K = jax.random.normal(kk, (B, Lk, D), jnp.float32)
    V = jax.random.normal(kv, (B, Lk, Dv), jnp.float32)
    # Make the trailing 32 keys "padding" (all-zero features) to exercise the key mask.
    K = K.at[:, Lk - 32:, :].set(0.0)

    out = jax.block_until_ready(self_attention_pallas(Q, K, V, attn_mask=False))
    out_c = jax.block_until_ready(self_attention_pallas(Q, K, V, attn_mask=True))

    ref = _reference(Q, K, V, attn_mask=False)
    ref_c = _reference(Q, K, V, attn_mask=True)

    assert jnp.allclose(out, ref, atol=3e-3, rtol=3e-3), "mismatch (no causal mask)"
    assert jnp.allclose(out_c, ref_c, atol=3e-3, rtol=3e-3), "mismatch (causal mask)"

    print("KERNEL_OK")
</pallas_src>

<mosaic_0001>
module attributes {stable_mosaic.version = 11 : i64} {
  func.func @_self_attention_kernel(%arg0: i32, %arg1: i32, %arg2: memref<1x128x128xf32, #tpu.memory_space<vmem>>, %arg3: memref<1x128x128xf32, #tpu.memory_space<vmem>>, %arg4: memref<1x128x128xf32, #tpu.memory_space<vmem>>, %arg5: memref<1x1x128xf32, #tpu.memory_space<vmem>>, %arg6: memref<1x128x128xf32, #tpu.memory_space<vmem>>) attributes {dimension_semantics = [#tpu.dimension_semantics<parallel>, #tpu.dimension_semantics<parallel>], iteration_bounds = array<i64: 2, 1>, scalar_prefetch = 0 : i64, scratch_operands = 0 : i64, tpu.core_type = #tpu.core_type<tc>, window_params = [{transform_indices = @transform_0, window_bounds = array<i64: 1, 128, 128>}, {transform_indices = @transform_1, window_bounds = array<i64: 1, 128, 128>}, {transform_indices = @transform_2, window_bounds = array<i64: 1, 128, 128>}, {transform_indices = @transform_3, window_bounds = array<i64: 1, 1, 128>}, {transform_indices = @transform_4, window_bounds = array<i64: 1, 128, 128>}]} {
    %c0 = arith.constant 0 : index
    %c0_0 = arith.constant 0 : index
    %c0_1 = arith.constant 0 : index
    %0 = vector.load %arg2[%c0, %c0_0, %c0_1] : memref<1x128x128xf32, #tpu.memory_space<vmem>>, vector<1x128x128xf32>
    %1 = vector.shape_cast %0 : vector<1x128x128xf32> to vector<128x128xf32>
    %c0_2 = arith.constant 0 : index
    %c0_3 = arith.constant 0 : index
    %c0_4 = arith.constant 0 : index
    %2 = vector.load %arg3[%c0_2, %c0_3, %c0_4] : memref<1x128x128xf32, #tpu.memory_space<vmem>>, vector<1x128x128xf32>
    %3 = vector.shape_cast %2 : vector<1x128x128xf32> to vector<128x128xf32>
    %c0_5 = arith.constant 0 : index
    %c0_6 = arith.constant 0 : index
    %c0_7 = arith.constant 0 : index
    %4 = vector.load %arg4[%c0_5, %c0_6, %c0_7] : memref<1x128x128xf32, #tpu.memory_space<vmem>>, vector<1x128x128xf32>
    %5 = vector.shape_cast %4 : vector<1x128x128xf32> to vector<128x128xf32>
    %cst = arith.constant dense<0.000000e+00> : vector<128x128xf32>
    %6 = tpu.matmul %1, %3, %cst {dimension_numbers = #tpu.dot_dimension_numbers<[1], [1], [0], [0], [0, 0, 1, 0], [], []>} : vector<128x128xf32>, vector<128x128xf32>, vector<128x128xf32> -> vector<128x128xf32>
    %cst_8 = arith.constant 0.0883883461 : f32
    %7 = vector.broadcast %cst_8 : f32 to vector<128x128xf32>
    %8 = arith.mulf %6, %7 : vector<128x128xf32>
    %c0_9 = arith.constant 0 : index
    %c0_10 = arith.constant 0 : index
    %c0_11 = arith.constant 0 : index
    %9 = vector.load %arg5[%c0_9, %c0_10, %c0_11] : memref<1x1x128xf32, #tpu.memory_space<vmem>>, vector<1x1x128xf32>
    %10 = vector.shape_cast %9 : vector<1x1x128xf32> to vector<1x128xf32>
    %cst_12 = arith.constant 0.000000e+00 : f32
    %11 = vector.broadcast %cst_12 : f32 to vector<1x128xf32>
    %12 = arith.cmpf oeq, %10, %11 : vector<1x128xf32>
    %cst_13 = arith.constant -4.2949673E+9 : f32
    %13 = vector.shape_cast %12 : vector<1x128xi1> to vector<1x128xi1>
    %14 = vector.broadcast %13 : vector<1x128xi1> to vector<128x128xi1>
    %15 = vector.broadcast %cst_13 : f32 to vector<128x128xf32>
    %16 = arith.select %14, %15, %8 : vector<128x128xi1>, vector<128x128xf32>
    %cst_14 = arith.constant dense<0xFF800000> : vector<128xf32>
    %17 = vector.multi_reduction <maximumf>, %16, %cst_14 [1] : vector<128x128xf32> to vector<128xf32>
    %18 = vector.shape_cast %17 : vector<128xf32> to vector<128x1xf32>
    %19 = vector.broadcast %18 : vector<128x1xf32> to vector<128x128xf32>
    %20 = arith.subf %16, %19 : vector<128x128xf32>
    %21 = math.exp %20 : vector<128x128xf32>
    %cst_15 = arith.constant dense<0.000000e+00> : vector<128xf32>
    %22 = vector.multi_reduction <add>, %21, %cst_15 [1] : vector<128x128xf32> to vector<128xf32>
    %23 = vector.shape_cast %22 : vector<128xf32> to vector<128x1xf32>
    %24 = vector.broadcast %23 : vector<128x1xf32> to vector<128x128xf32>
    %25 = arith.divf %21, %24 : vector<128x128xf32>
    %cst_16 = arith.constant dense<0.000000e+00> : vector<128x128xf32>
    %26 = tpu.matmul %25, %5, %cst_16 {dimension_numbers = #tpu.dot_dimension_numbers<[1], [0], [0], [1], [0, 0, 1, 1], [], []>} : vector<128x128xf32>, vector<128x128xf32>, vector<128x128xf32> -> vector<128x128xf32>
    %c0_17 = arith.constant 0 : index
    %c0_18 = arith.constant 0 : index
    %c0_19 = arith.constant 0 : index
    %27 = vector.load %arg6[%c0_17, %c0_18, %c0_19] : memref<1x128x128xf32, #tpu.memory_space<vmem>>, vector<1x128x128xf32>
    %28 = vector.shape_cast %27 : vector<1x128x128xf32> to vector<128x128xf32>
    %29 = vector.shape_cast %26 : vector<128x128xf32> to vector<1x128x128xf32>
    tpu.vector_store %arg6[%c0_17, %c0_18, %c0_19], %29 {strides = array<i32>} : memref<1x128x128xf32, #tpu.memory_space<vmem>>, vector<1x128x128xf32>,
    return
  }
  func.func @transform_0(%arg0: i32, %arg1: i32) -> (i32, i32, i32) {
    %c0_i32 = arith.constant 0 : i32
    %c0_i32_0 = arith.constant 0 : i32
    return %arg0, %arg1, %c0_i32 : i32, i32, i32
  }
  func.func @transform_1(%arg0: i32, %arg1: i32) -> (i32, i32, i32) {
    %c0_i32 = arith.constant 0 : i32
    %c0_i32_0 = arith.constant 0 : i32
    %c0_i32_1 = arith.constant 0 : i32
    return %arg0, %c0_i32, %c0_i32_0 : i32, i32, i32
  }
  func.func @transform_2(%arg0: i32, %arg1: i32) -> (i32, i32, i32) {
    %c0_i32 = arith.constant 0 : i32
    %c0_i32_0 = arith.constant 0 : i32
    %c0_i32_1 = arith.constant 0 : i32
    return %arg0, %c0_i32, %c0_i32_0 : i32, i32, i32
  }
  func.func @transform_3(%arg0: i32, %arg1: i32) -> (i32, i32, i32) {
    %c0_i32 = arith.constant 0 : i32
    %c0_i32_0 = arith.constant 0 : i32
    %c0_i32_1 = arith.constant 0 : i32
    return %arg0, %c0_i32, %c0_i32_0 : i32, i32, i32
  }
  func.func @transform_4(%arg0: i32, %arg1: i32) -> (i32, i32, i32) {
    %c0_i32 = arith.constant 0 : i32
    %c0_i32_0 = arith.constant 0 : i32
    return %arg0, %arg1, %c0_i32 : i32, i32, i32
  }
}

</mosaic_0001>

<bundles_post_ra>
// kernel: tpu_custom_call.1
= control target key start
LH: loop header
LB: loop body
LE: loop exit
PB: predicated region body
PF: predicated region fallthrough
CT: control target
= control target key end

     0   :  { %s2165_s0 = inlined_call_operand.hbm [shape: f32[2,128,128], index: 0, kind: input, shape index: {}]   ;;  %s2166_s1 = inlined_call_operand.hbm [shape: f32[2,128,128], index: 1, kind: input, shape index: {}]   ;;  %s2167_s2 = inlined_call_operand.hbm [shape: f32[2,128,128], index: 2, kind: input, shape index: {}]   ;;  %s2168_s3 = inlined_call_operand.vmem [shape: f32[2,1,128], index: 3, kind: input, shape index: {}]   ;;  %s2169_s4 = inlined_call_operand.hbm [shape: f32[2,128,128], index: 4, kind: output, shape index: {}]  }
   0x1   :  { %2181 = sst [smem:[#allocation16_spill]] %s2166_s1 }
   0x2   :  { %9 = vsyncpa [#allocation3], 0 }
   0x3   :  { %11 = vsyncpa [#allocation3 + $0x1], 0 }
   0x4   :  { %12 = vsyncpa [#allocation6], 0 }
   0x5   :  { %14 = vsyncpa [#allocation6 + $0x1], 0 }
   0x6   :  { %15 = vsyncpa [#allocation4], 0 }
   0x7   :  { %17 = vsyncpa [#allocation4 + $0x1], 0  ;;  %s1640_s15 = smov 0   ;;  %s1642_s16 = smov 0  }
   0x8   :  { %s1644_s17 = smov 0   ;;  %s1646_s18 = smov 0  }
   0x9   :  { %s1648_s19 = smov 0   ;;  %s1650_s20 = smov 0  }
   0xa LB: > { %2182 = sst [smem:[#allocation12_spill]] %s1600_s19  ;;  %s1671_s21 = sadd.s32 4294967295, %s1604_s20   ;;  %s1604_s20 = sphi %s1650_s20, %s23_s20   ;;  %s1600_s19 = sphi %s1648_s19, %s2207_s19   ;;  %s1596_s18 = sphi %s1646_s18, %s2206_s18   ;;  %s1592_s17 = sphi %s1644_s17, %s2210_s17   ;;  %s1588_s16 = sphi %s1642_s16, %s2209_s16   ;;  %s1584_s15 = sphi %s1640_s15, %s2208_s15  }
   0xb   : > { %2183 = sst [smem:[#allocation13_spill]] %s1604_s20  ;;  %s1021_s22 = sadd.s32 4294967294, %s1604_s20  }
   0xc   : > { %s35_s23 = sadd.s32 1, %s1600_s19  ;;  %s44_s24 = sadd.s32 1, %s1592_s17 }
   0xd   : > { %p37_p0 = scmp.ge.s32.totalorder %s35_s23, 2  ;;  %p51_p1 = scmp.ne.s32.totalorder %s1592_s17, %s1588_s16 }
   0xe   : > { %p52_p2 = scmp.eq.s32.totalorder %s1604_s20, 0  ;;  %p57_p3 = scmp.ne.s32.totalorder %s1588_s16, %s1584_s15 }
   0xf   : > { %s2212_s23 = smov (%p37_p0, %s35_s23), 0  ;;  %p58_p5 = scmp.eq.s32.totalorder %s1671_s21, 0 }
  0x10   : > { %2184 = sst [smem:[#allocation14_spill]] %s2212_s23  ;;  %p1683_p4 = por %p52_p2, %p51_p1 }
  0x11   : > { %s39_s26 = ssub.s32 %s1600_s19, %s2212_s23  ;;  %p161_p6 = scmp.eq.s32.totalorder %s1671_s21, 1 }
  0x12   : > { %p42_p7 = scmp.eq.s32.totalorder %s39_s26, 0  ;;  %p1691_p8 = por %p58_p5, %p57_p3 }
  0x13   : > { %p1695_p9 = por %p161_p6, %p51_p1  ;;  %p167_p10 = scmp.eq.s32.totalorder %s1021_s22, 1 }
  0x14   : > { %s2186_s27 = scalar_select %p1691_p8, 1, 0 }
  0x15   : > { %s2187_s28 = scalar_select %p1695_p9, 1, 0 }
  0x16   : > { %s1700_s29 = scalar_select %p42_p7, %s1592_s17, %s44_s24  }
  0x17   : > { %p1702_p11 = por %p167_p10, %p57_p3  ;;  %p1309_p13 = scmp.lt.s32.totalorder %s1604_s20, 2 }
  0x18   : > { %2188 = sst [smem:[#allocation15_spill]] %s1700_s29  ;;  %s2170_s5 = sand.u32 1, %s1592_s17  }
  0x19   : > { %s2189_s30 = scalar_select %p1702_p11, 1, 0 }
  0x1a   : > { %s1711_s6 = sshll.u32 %s2170_s5, 7  ;;  %s1714_s7 = sshll.u32 %s1600_s19, 11 }
  0x1b   : > { %p1718_p0 = pnand %p1309_p13, %p1683_p4  ;;  %s210_s9 = sand.u32 1, %s1604_s20  }
  0x1c   : > { %s2191_s1 = sld [smem:[#allocation16_spill]]  ;;  %s214_s13 = scalar_lea.vmem [#allocation5], %s1711_s6 }
  0x1d   : > { %s221_s14 = sshll.u32 %s214_s13, 4  ;;  %s1734_s22 = scalar_lea.sflag [#allocation6], %s210_s9  ;;  %s1731_s14 = int_to_ptr.vmem [resolvable:$true] %s221_s14 }
  0x1e   : > { %p1740_p4 = pneg %p1718_p0 }
  0x22   : > { %s1727_s12 = scalar_lea.hbm %s2191_s1, %s1714_s7  ;;  %s1433_s11 = scalar_lea.hbm %s2191_s1, 4096 }
  0x23   : > { %s1428_s24 = scalar_lea.hbm %s1727_s12, 2048  ;;  %p1434_p7 = scmp.lt.u32.totalorder %s1727_s12, %s2191_s1 }
  0x24   : > { %p1429_p3 = scmp.ne.s32.totalorder %s1727_s12, %s1428_s24  ;;  %p1435_p10 = scmp.lt.u32.totalorder %s1433_s11, %s1428_s24 }
  0x25   : > { %p1437_p12 = scmp.lt.u32.totalorder %s1428_s24, %s1727_s12 }
  0x26   : > { %p1431_p5 = pnand %p1740_p4, %p1429_p3  ;;  %p1436_p13 = por %p1435_p10, %p1434_p7 }
  0x28   : > { %p1432_p6 = pneg %p1431_p5  ;;  %p1438_p1 = por %p1437_p12, %p1436_p13 }
  0x2a   : > { %p1439_p2 = pnand %p1438_p1, %p1432_p6 }
  0x2c   : > { %1442 = shalt.err (!%p1439_p2)
}
  0x2d   : > { %s1443_s9 = scalar_lea.vmem %s1731_s14, 2048  ;;  %s1606_s26 = smov [#allocation5]  }
  0x2e   : > { %p1444_p3 = scmp.ne.s32.totalorder %s1731_s14, %s1443_s9  ;;  %s1448_s10 = sshll.u32 %s1606_s26, 4  ;;  %s1449_s10 = int_to_ptr.vmem [resolvable:$false] %s1448_s10 }
  0x2f   : > { %s1450_s5 = scalar_lea.vmem %s1449_s10, 4096  ;;  %p1451_p9 = scmp.lt.s32.totalorder %s1731_s14, %s1449_s10 }
  0x30   : > { %p1446_p5 = pnand %p1444_p3, %p1740_p4  ;;  %p1452_p8 = scmp.lt.s32.totalorder %s1450_s5, %s1443_s9 }
  0x32   : > { %p1447_p11 = pneg %p1446_p5  ;;  %p1453_p7 = por %p1452_p8, %p1451_p9 }
  0x34   : > { %p1454_p10 = pnand %p1453_p7, %p1447_p11 }
  0x36   : > { %1457 = shalt.err (!%p1454_p10)
}
  0x37   : > { %s2173_s24 = smov 128   ;;  %s2175_s11 = smov 8  }
  0x38   : > { %1301 = dma.hbm_to_vmem [thread:$0]  (!%p1718_p0), %s1727_s12, 2048, %s1731_s14, %s1734_s22, %s2173_s24, %s2173_s24, %s2175_s11  }
  0x39   : > { %p2193_p8 = scmp.lt.s32.totalorder %s1604_s20, 3  ;;  %p2194_p9 = scmp.ge.s32.totalorder %s1604_s20, 1 }
  0x3a   : > { %s1779_s10 = scalar_lea.hbm %s2165_s0, %s1714_s7  ;;  %s191_s5 = scalar_lea.vmem [#allocation2], %s1711_s6 }
  0x3b   : > { %p1771_p11 = pnand %p2194_p9, %p2193_p8  ;;  %s200_s1 = sshll.u32 %s191_s5, 4  ;;  %s1782_s1 = int_to_ptr.vmem [resolvable:$true] %s200_s1 }
  0x3c   : > { %s1788_s24 = scalar_lea.hbm %s2167_s2, %s1714_s7  ;;  %s2196_s11 = sand.u32 1, %s1592_s17  }
  0x3d   : > { %s2195_s13 = scalar_select %p1771_p11, 1, 0 }
  0x3e   : > { %s1792_s23 = scalar_lea.sflag [#allocation3], %s2196_s11  ;;  %s1458_s19 = scalar_lea.hbm %s1779_s10, 2048 }
  0x3f   : > { %p1459_p12 = scmp.ne.s32.totalorder %s1779_s10, %s1458_s19  ;;  %s1463_s29 = scalar_lea.hbm %s2165_s0, 4096 }
  0x40   : > { %p1464_p6 = scmp.lt.u32.totalorder %s1779_s10, %s2165_s0  ;;  %p1465_p13 = scmp.lt.u32.totalorder %s1463_s29, %s1458_s19 }
  0x41   : > { %p1461_p1 = pnand %p1459_p12, %p1740_p4  ;;  %p1467_p5 = scmp.lt.u32.totalorder %s1458_s19, %s1779_s10 }
  0x42   : > { %p1466_p3 = por %p1465_p13, %p1464_p6 }
  0x43   : > { %p1462_p2 = pneg %p1461_p1 }
  0x44   : > { %p1468_p7 = por %p1467_p5, %p1466_p3 }
  0x46   : > { %p1469_p10 = pnand %p1468_p7, %p1462_p2 }
  0x48   : > { %1472 = shalt.err (!%p1469_p10)
}
  0x49   : > { %s1473_s7 = scalar_lea.vmem %s1782_s1, 2048  ;;  %s1609_s11 = smov [#allocation2]  }
  0x4a   : > { %p1474_p8 = scmp.ne.s32.totalorder %s1782_s1, %s1473_s7  ;;  %s1478_s12 = sshll.u32 %s1609_s11, 4  ;;  %s1479_s12 = int_to_ptr.vmem [resolvable:$false] %s1478_s12 }
  0x4b   : > { %s1480_s20 = scalar_lea.vmem %s1479_s12, 4096  ;;  %p1481_p1 = scmp.lt.s32.totalorder %s1782_s1, %s1479_s12 }
  0x4c   : > { %p1476_p9 = pnand %p1474_p8, %p1740_p4  ;;  %p1482_p11 = scmp.lt.s32.totalorder %s1480_s20, %s1473_s7 }
  0x4e   : > { %p1477_p12 = pneg %p1476_p9  ;;  %p1483_p6 = por %p1482_p11, %p1481_p1 }
  0x50   : > { %p1484_p13 = pnand %p1483_p6, %p1477_p12 }
  0x52   : > { %1487 = shalt.err (!%p1484_p13)
}
  0x53   : > { %s2197_s19 = smov 8   ;;  %s2198_s29 = smov 128  }
  0x54   : > { %1298 = dma.hbm_to_vmem [thread:$0]  (!%p1718_p0), %s1779_s10, 2048, %s1782_s1, %s1792_s23, %s2198_s29, %s2198_s29, %s2197_s19  }
  0x55   : > { %s235_s14 = scalar_lea.vmem [#allocation7], %s1711_s6  ;;  %s1488_s26 = scalar_lea.hbm %s1788_s24, 2048 }
  0x56   : > { %s242_s9 = sshll.u32 %s235_s14, 4  ;;  %p1489_p11 = scmp.ne.s32.totalorder %s1788_s24, %s1488_s26  ;;  %s1820_s9 = int_to_ptr.vmem [resolvable:$true] %s242_s9 }
  0x57   : > { %s1493_s11 = scalar_lea.hbm %s2167_s2, 4096  ;;  %p1494_p5 = scmp.lt.u32.totalorder %s1788_s24, %s2167_s2 }
  0x58   : > { %p1491_p2 = pnand %p1489_p11, %p1740_p4  ;;  %p1495_p7 = scmp.lt.u32.totalorder %s1493_s11, %s1488_s26 }
  0x59   : > { %p1497_p8 = scmp.lt.u32.totalorder %s1488_s26, %s1788_s24 }
  0x5a   : > { %p1492_p3 = pneg %p1491_p2  ;;  %p1496_p10 = por %p1495_p7, %p1494_p5 }
  0x5c   : > { %p1498_p9 = por %p1497_p8, %p1496_p10 }
  0x5e   : > { %p1499_p12 = pnand %p1498_p9, %p1492_p3 }
  0x60   : > { %1502 = shalt.err (!%p1499_p12)
}
  0x61   : > { %s1503_s1 = scalar_lea.vmem %s1820_s9, 2048  ;;  %s1610_s23 = smov [#allocation7]  }
  0x62   : > { %p1504_p1 = scmp.ne.s32.totalorder %s1820_s9, %s1503_s1  ;;  %s1508_s6 = sshll.u32 %s1610_s23, 4  ;;  %s1509_s6 = int_to_ptr.vmem [resolvable:$false] %s1508_s6 }
  0x63   : > { %s1510_s10 = scalar_lea.vmem %s1509_s6, 4096  ;;  %p1511_p11 = scmp.lt.s32.totalorder %s1820_s9, %s1509_s6 }
  0x64   : > { %p1506_p6 = pnand %p1504_p1, %p1740_p4  ;;  %p1512_p2 = scmp.lt.s32.totalorder %s1510_s10, %s1503_s1 }
  0x66   : > { %p1507_p13 = pneg %p1506_p6  ;;  %p1513_p5 = por %p1512_p2, %p1511_p11 }
  0x68   : > { %p1514_p7 = pnand %p1513_p5, %p1507_p13 }
  0x6a   : > { %1517 = shalt.err (!%p1514_p7)
}
  0x6b   : > { %1304 = dma.hbm_to_vmem [thread:$0]  (!%p1718_p0), %s1788_s24, 2048, %s1820_s9, %s1734_s22, %s2198_s29, %s2198_s29, %s2197_s19  }
  0x6c   : > { %p2199_p4 = scmp.ne.s32.totalorder %s2195_s13, 0 }
  0x6d   : > { %s1850_s25 = sand.u32 (!%p2199_p4), 1, %s1588_s16   ;;  %p2200_p3 = scmp.ne.s32.totalorder (!%p2199_p4), %s2186_s27, 0 }
  0x6e   : > { %260 = sbr.rel (%p2199_p4) target bundleno = 976 (0x3d0), region = 36  ;;  %s1853_s14 = sshll.u32 (!%p2199_p4), %s1850_s25, 7 }
  0x6f   : > { %s263_s8 = scalar_lea.sflag (!%p2199_p4), [#allocation3], %s1850_s25  ;;  %s1857_s26 = scalar_lea.vmem (!%p2199_p4), [#allocation2], %s1853_s14 }
  0x75   : > { %1571 = dma.done.wait (%p2200_p3), %s263_s8, 2048  }
  0x76   : > { %1573 = vsyncadd (%p2200_p3), %s263_s8, 4294965248  ;;  %s271_s22 = sand.u32 1, %s1671_s21   ;;  %s1865_s13 = scalar_lea.vmem [#allocation5], %s1853_s14 }
  0x77   : > { %s272_s24 = scalar_lea.sflag [#allocation6], %s271_s22 }
  0x78   : > { %1575 = dma.done.wait (%p2200_p3), %s272_s24, 4096  }
  0x79   : > { %1577 = vsyncadd (%p2200_p3), %s272_s24, 4294963200  ;;  %v343_v0 = vld [vmem:[%s1865_s13] sm:$0xff]  ;;  %v344_v1 = vld [vmem:[%s1865_s13 + $0x8] sm:$0xff]  ;;  %p323_p0 = scmp.lt.s32.totalorder %s1596_s18, 1  ;;  %v539_v40 = vlaneseq  ;;  %v1611_v44 = vmov 0   ;;  %s1992_s9 = scalar_lea.vmem [#allocation7], %s1853_s14 }
  0x7a   : > { %v345_v2 = vld [vmem:[%s1865_s13 + $0x10] sm:$0xff]  ;;  %v1223_v3 = vpack.c.bf16 %v344_v1, %v343_v0  ;;  %v346_v4 = vld [vmem:[%s1865_s13 + $0x18] sm:$0xff]  ;;  %v327_v6 = vld [vmem:[%s1857_s26] sm:$0xff]  ;;  %s2091_s5 = scalar_lea.vmem [#allocation8], %s1853_s14  ;;  %s1046_s7 = sshll.u32 %s1596_s18, 11 }
  0x7b   : > { %v1227_v5 = vpack.c.bf16 %v346_v4, %v345_v2  ;;  %v347_v7 = vld [vmem:[%s1865_s13 + $0x20] sm:$0xff]  ;;  %v348_v8 = vld [vmem:[%s1865_s13 + $0x28] sm:$0xff]  ;;  %1143 = vmatprep.mubr.f32.mxu0 %v327_v6  ;;  %v349_v10 = vld [vmem:[%s1865_s13 + $0x30] sm:$0xff]  ;;  %s324_s21 = scalar_select %p323_p0, %s1596_s18, 1  ;;  %v540_v42 = vshrl.u32 %v539_v40, 7 }
  0x7c   : > { %1224 = vmatprep.subr.bf16.mxu0 %v1223_v3  ;;  %v1231_v9 = vpack.c.bf16 %v348_v8, %v347_v7  ;;  %v350_v11 = vld [vmem:[%s1865_s13 + $0x38] sm:$0xff]  ;;  %v351_v13 = vld [vmem:[%s1865_s13 + $0x40] sm:$0xff]  ;;  %v352_v14 = vld [vmem:[%s1865_s13 + $0x48] sm:$0xff]  ;;  %s881_s11 = sshll.u32 %s2091_s5, 4  ;;  %s2112_s1 = scalar_lea.hbm %s2169_s4, %s1046_s7  ;;  %s2114_s11 = int_to_ptr.vmem [resolvable:$true] %s881_s11 }
  0x7d   : > { %1226 = vmatpush3.bf16.xpose.msra.mxu0 %v1223_v3  ;;  %v1235_v12 = vpack.c.bf16 %v350_v11, %v349_v10  ;;  %v1239_v15 = vpack.c.bf16 %v352_v14, %v351_v13  ;;  %v353_v16 = vld [vmem:[%s1865_s13 + $0x50] sm:$0xff]  ;;  %v354_v17 = vld [vmem:[%s1865_s13 + $0x58] sm:$0xff]  ;;  %v355_v19 = vld [vmem:[%s1865_s13 + $0x60] sm:$0xff]  ;;  %s325_s29 = scalar_lea.vmem %s2168_s3, %s324_s21  ;;  %v541_v43 = vsub.s32 0, %v540_v42  ;;  %s866_s23 = scalar_lea.sflag [#allocation4], %s1850_s25 }
  0x7e   : > { %1228 = vmatprep.subr.bf16.mxu0 %v1227_v5  ;;  %v1243_v18 = vpack.c.bf16 %v354_v17, %v353_v16  ;;  %v356_v20 = vld [vmem:[%s1865_s13 + $0x68] sm:$0xff]  ;;  %v357_v22 = vld [vmem:[%s1865_s13 + $0x70] sm:$0xff]  ;;  %v358_v23 = vld [vmem:[%s1865_s13 + $0x78] sm:$0xff]  ;;  %s1518_s18 = scalar_lea.vmem %s2114_s11, 2048  ;;  %p2201_p8 = scmp.ne.s32.totalorder %s2187_s28, 0 }
  0x7f   : > { %v1247_v21 = vpack.c.bf16 %v356_v20, %v355_v19  ;;  %v1251_v24 = vpack.c.bf16 %v358_v23, %v357_v22  ;;  %v328_v25 = vld [vmem:[%s1857_s26 + $0x8] sm:$0xff]  ;;  %v329_v26 = vld [vmem:[%s1857_s26 + $0x10] sm:$0xff]  ;;  %v330_v27 = vld [vmem:[%s1857_s26 + $0x18] sm:$0xff]  ;;  %p1519_p10 = scmp.ne.s32.totalorder %s2114_s11, %s1518_s18  ;;  %s1612_s6 = smov [#allocation8]  }
  0x80   : > { %v331_v28 = vld [vmem:[%s1857_s26 + $0x20] sm:$0xff]  ;;  %v332_v29 = vld [vmem:[%s1857_s26 + $0x28] sm:$0xff]  ;;  %v333_v30 = vld [vmem:[%s1857_s26 + $0x30] sm:$0xff]  ;;  %s1522_s10 = sshll.u32 %s1612_s6, 4  ;;  %s1523_s10 = int_to_ptr.vmem [resolvable:$false] %s1522_s10 }
  0x81   : > { %v334_v31 = vld [vmem:[%s1857_s26 + $0x38] sm:$0xff]  ;;  %v335_v32 = vld [vmem:[%s1857_s26 + $0x40] sm:$0xff]  ;;  %v336_v33 = vld [vmem:[%s1857_s26 + $0x48] sm:$0xff]  ;;  %p1520_p9 = pnand %p1519_p10, %p2201_p8  ;;  %s1524_s14 = scalar_lea.vmem %s1523_s10, 4096 }
  0x82   : > { %v337_v34 = vld [vmem:[%s1857_s26 + $0x50] sm:$0xff]  ;;  %v338_v35 = vld [vmem:[%s1857_s26 + $0x58] sm:$0xff]  ;;  %v339_v36 = vld [vmem:[%s1857_s26 + $0x60] sm:$0xff]  ;;  %p1525_p1 = scmp.lt.s32.totalorder %s2114_s11, %s1523_s10  ;;  %p1526_p6 = scmp.lt.s32.totalorder %s1524_s14, %s1518_s18 }
  0x83   : > { %v340_v37 = vld [vmem:[%s1857_s26 + $0x68] sm:$0xff]  ;;  %v341_v38 = vld [vmem:[%s1857_s26 + $0x70] sm:$0xff]  ;;  %v342_v39 = vld [vmem:[%s1857_s26 + $0x78] sm:$0xff]  ;;  %p1521_p12 = pneg %p1520_p9 }
  0x84   : > { %v536_v41 = vld [vmem:[%s325_s29] sm:$0x1]  ;;  %v365_v40 = vld [vmem:[%s1992_s9 + $0x30] sm:$0xff]  ;;  %p1527_p13 = por %p1526_p6, %p1525_p1 }
  0x85   : > { %1230 = vmatpush3.bf16.xpose.msra.mxu0 %v1227_v5  ;;  %vm537_vm0 = vcmp.eq.f32.partialorder %v536_v41, 0.0  ;;  %v366_v41 = vld [vmem:[%s1992_s9 + $0x38] sm:$0xff] }
  0x86   : > { %1232 = vmatprep.subr.bf16.mxu0 %v1231_v9  ;;  %v538_v45 = vsel %vm537_vm0, 1, %v1611_v44  ;;  %v1267_v42 = vpack.c.bf16 %v366_v41, %v365_v40  ;;  %v370_v40 = vld [vmem:[%s1992_s9 + $0x58] sm:$0xff]  ;;  %p1528_p11 = pnand %p1527_p13, %p1521_p12 }
  0x87   : > { %v1908_v46 = vrot.slane %v538_v45, %v541_v43 }
  0x89   : > { %vm543_vm1 = vcmp.eq.s32.totalorder %v1908_v46, 1 }
  0x8d   : > { %1234 = vmatpush3.bf16.xpose.msra.mxu0 %v1231_v9 }
  0x8e   : > { %1236 = vmatprep.subr.bf16.mxu0 %v1235_v12 }
  0x95   : > { %1238 = vmatpush3.bf16.xpose.msra.mxu0 %v1235_v12 }
  0x96   : > { %1240 = vmatprep.subr.bf16.mxu0 %v1239_v15 }
  0x9d   : > { %1242 = vmatpush3.bf16.xpose.msra.mxu0 %v1239_v15 }
  0x9e   : > { %1244 = vmatprep.subr.bf16.mxu0 %v1243_v18 }
  0xa5   : > { %1246 = vmatpush3.bf16.xpose.msra.mxu0 %v1243_v18 }
  0xa6   : > { %1248 = vmatprep.subr.bf16.mxu0 %v1247_v21 }
  0xad   : > { %1250 = vmatpush3.bf16.xpose.msra.mxu0 %v1247_v21 }
  0xae   : > { %1252 = vmatprep.subr.bf16.mxu0 %v1251_v24 }
  0xb5   : > { %1254 = vmatpush3.bf16.xpose.msra.mxu0 %v1251_v24 }
  0xbc   : > { %1144 = vmatmul.mubr.f32.vlgmr.msra.gmra.mrb[0].mxu0 %v328_v25 }
  0xbd   : > { %1146 = vmatprep.mubr.f32.mxu0 %v329_v26 }
  0xc0   : > { %1147 = vmatmul.mubr.f32.gmra.mrb[2].mxu0 %v330_v27 }
  0xc1   : > { %1149 = vmatprep.mubr.f32.mxu0 %v331_v28 }
  0xc4   : > { %1150 = vmatmul.mubr.f32.gmra.mrb[4].mxu0 %v332_v29 }
  0xc5   : > { %1152 = vmatprep.mubr.f32.mxu0 %v333_v30 }
  0xc8   : > { %1153 = vmatmul.mubr.f32.gmra.mrb[6].mxu0 %v334_v31  ;;  %v359_v31 = vld [vmem:[%s1992_s9] sm:$0xff] }
  0xc9   : > { %1155 = vmatprep.mubr.f32.mxu0 %v335_v32  ;;  %v360_v32 = vld [vmem:[%s1992_s9 + $0x8] sm:$0xff] }
  0xcc   : > { %1156 = vmatmul.mubr.f32.gmra.mrb[8].mxu0 %v336_v33  ;;  %v361_v33 = vld [vmem:[%s1992_s9 + $0x10] sm:$0xff] }
  0xcd   : > { %1158 = vmatprep.mubr.f32.mxu0 %v337_v34  ;;  %v1255_v34 = vpack.c.bf16 %v360_v32, %v359_v31 }
  0xcf   : > { %1256 = vmatprep.subr.bf16.mxu1 %v1255_v34 }
  0xd0   : > { %1159 = vmatmul.mubr.f32.gmra.mrb[10].mxu0 %v338_v35  ;;  %v362_v35 = vld [vmem:[%s1992_s9 + $0x18] sm:$0xff]  ;;  %1258 = vmatpush3.bf16.msra.mxu1 %v1255_v34 }
  0xd1   : > { %1161 = vmatprep.mubr.f32.mxu0 %v339_v36  ;;  %v1259_v36 = vpack.c.bf16 %v362_v35, %v361_v33  ;;  %v368_v33 = vld [vmem:[%s1992_s9 + $0x48] sm:$0xff] }
  0xd3   : > { %1260 = vmatprep.subr.bf16.mxu1 %v1259_v36 }
  0xd4   : > { %1162 = vmatmul.mubr.f32.gmra.mrb[12].mxu0 %v340_v37  ;;  %v363_v37 = vld [vmem:[%s1992_s9 + $0x20] sm:$0xff]  ;;  %1262 = vmatpush3.bf16.msra.mxu1 %v1259_v36 }
  0xd5   : > { %1164 = vmatprep.mubr.f32.mxu0 %v341_v38  ;;  %v364_v38 = vld [vmem:[%s1992_s9 + $0x28] sm:$0xff] }
  0xd8   : > { %1165 = vmatmul.mubr.f32.gmra.mrb[14].mxu0 %v342_v39  ;;  %v1263_v39 = vpack.c.bf16 %v364_v38, %v363_v37 }
  0xda   : > { %1264 = vmatprep.subr.bf16.mxu1 %v1263_v39 }
  0xdb   : > { %1266 = vmatpush3.bf16.msra.mxu1 %v1263_v39 }
  0xdc   : > { %1268 = vmatprep.subr.bf16.mxu1 %v1267_v42 }
  0xdf   : > { %1270 = vmatpush3.bf16.msra.mxu1 %v1267_v42 }
 0x18f   : > { %v1145_v47 = vpop.f32.mrb[0].mxu0 }
 0x190   : > { %v441_v48 = vpop.f32.mrb[1].mxu0  ;;  %v521_v50 = vmul.f32 0.088388346, %v1145_v47 }
 0x191   : > { %v520_v49 = vmul.f32 0.088388346, %v441_v48 }
 0x192   : > { %v1918_v57 = vsel %vm543_vm1, -4.2949673e+09, %v521_v50 }
 0x193   : > { %v1148_v51 = vpop.f32.mrb[2].mxu0  ;;  %v1913_v52 = vsel %vm543_vm1, -4.2949673e+09, %v520_v49 }
 0x194   : > { %560 = vmax.xlane.f32.xlu0 %v1913_v52  ;;  %v451_v53 = vpop.f32.mrb[3].mxu0  ;;  %v523_v55 = vmul.f32 0.088388346, %v1148_v51 }
 0x195   : > { %v522_v54 = vmul.f32 0.088388346, %v451_v53 }
 0x196   : > { %v1928_v63 = vsel %vm543_vm1, -4.2949673e+09, %v523_v55 }
 0x197   : > { %v1151_v56 = vpop.f32.mrb[4].mxu0  ;;  %v1922_v58 = vsel %vm543_vm1, -4.2949673e+09, %v522_v54 }
 0x198   : > { %562 = vmax.xlane.f32.xlu0 %v1918_v57  ;;  %564 = vmax.xlane.f32.xlu1 %v1922_v58  ;;  %v461_v59 = vpop.f32.mrb[5].mxu0  ;;  %v525_v61 = vmul.f32 0.088388346, %v1151_v56 }
 0x199   : > { %v524_v60 = vmul.f32 0.088388346, %v461_v59 }
 0x19a   : > { %v1938_v5 = vsel %vm543_vm1, -4.2949673e+09, %v525_v61 }
 0x19b   : > { %v1154_v62 = vpop.f32.mrb[6].mxu0  ;;  %v1932_v0 = vsel %vm543_vm1, -4.2949673e+09, %v524_v60 }
 0x19c   : > { %566 = vmax.xlane.f32.xlu1 %v1928_v63  ;;  %568 = vmax.xlane.f32.xlu0 %v1932_v0  ;;  %v471_v1 = vpop.f32.mrb[7].mxu0  ;;  %v527_v3 = vmul.f32 0.088388346, %v1154_v62 }
 0x19d   : > { %v526_v2 = vmul.f32 0.088388346, %v471_v1 }
 0x19e   : > { %v1948_v11 = vsel %vm543_vm1, -4.2949673e+09, %v527_v3 }
 0x19f   : > { %v1157_v4 = vpop.f32.mrb[8].mxu0  ;;  %v1942_v6 = vsel %vm543_vm1, -4.2949673e+09, %v526_v2 }
 0x1a0   : > { %570 = vmax.xlane.f32.xlu1 %v1938_v5  ;;  %572 = vmax.xlane.f32.xlu0 %v1942_v6  ;;  %v481_v7 = vpop.f32.mrb[9].mxu0  ;;  %v529_v9 = vmul.f32 0.088388346, %v1157_v4 }
 0x1a1   : > { %v528_v8 = vmul.f32 0.088388346, %v481_v7 }
 0x1a2   : > { %v1958_v17 = vsel %vm543_vm1, -4.2949673e+09, %v529_v9 }
 0x1a3   : > { %v1160_v10 = vpop.f32.mrb[10].mxu0  ;;  %v1952_v12 = vsel %vm543_vm1, -4.2949673e+09, %v528_v8 }
 0x1a4   : > { %574 = vmax.xlane.f32.xlu1 %v1948_v11  ;;  %576 = vmax.xlane.f32.xlu0 %v1952_v12  ;;  %v491_v13 = vpop.f32.mrb[11].mxu0  ;;  %v531_v15 = vmul.f32 0.088388346, %v1160_v10 }
 0x1a5   : > { %v530_v14 = vmul.f32 0.088388346, %v491_v13 }
 0x1a6   : > { %v1968_v23 = vsel %vm543_vm1, -4.2949673e+09, %v531_v15 }
 0x1a7   : > { %v1163_v16 = vpop.f32.mrb[12].mxu0  ;;  %v1962_v18 = vsel %vm543_vm1, -4.2949673e+09, %v530_v14 }
 0x1a8   : > { %578 = vmax.xlane.f32.xlu1 %v1958_v17  ;;  %580 = vmax.xlane.f32.xlu0 %v1962_v18  ;;  %v501_v19 = vpop.f32.mrb[13].mxu0  ;;  %v533_v21 = vmul.f32 0.088388346, %v1163_v16 }
 0x1a9   : > { %v532_v20 = vmul.f32 0.088388346, %v501_v19 }
 0x1aa   : > { %v1978_v28 = vsel %vm543_vm1, -4.2949673e+09, %v533_v21 }
 0x1ab   : > { %v1166_v22 = vpop.f32.mrb[14].mxu0  ;;  %v1972_v24 = vsel %vm543_vm1, -4.2949673e+09, %v532_v20 }
 0x1ac   : > { %582 = vmax.xlane.f32.xlu1 %v1968_v23  ;;  %584 = vmax.xlane.f32.xlu0 %v1972_v24  ;;  %v511_v25 = vpop.f32.mrb[15].mxu0  ;;  %v535_v27 = vmul.f32 0.088388346, %v1166_v22 }
 0x1ad   : > { %v534_v26 = vmul.f32 0.088388346, %v511_v25 }
 0x1ae   : > { %v1988_v30 = vsel %vm543_vm1, -4.2949673e+09, %v535_v27 }
 0x1af   : > { %v1982_v29 = vsel %vm543_vm1, -4.2949673e+09, %v534_v26 }
 0x1b0   : > { %586 = vmax.xlane.f32.xlu1 %v1978_v28  ;;  %588 = vmax.xlane.f32.xlu0 %v1982_v29 }
 0x1b4   : > { %590 = vmax.xlane.f32.xlu1 %v1988_v30 }
 0x221   : > { %v561_v43 = vpop.xlane.xlu0 %560 }
 0x222   : > { %v592_v44 = vsub.f32 %v1913_v52, %v561_v43 }
 0x224   : > { %v608_v45 = vmul.f32 1.442695, %v592_v44 }
 0x225   : > { %v563_v46 = vpop.xlane.xlu0 %562  ;;  %v565_v47 = vpop.xlane.xlu1 %564 }
 0x226   : > { %1364 = vpow2.f32 %v608_v45  ;;  %v593_v48 = vsub.f32 %v1918_v57, %v563_v46  ;;  %v594_v49 = vsub.f32 %v1922_v58, %v565_v47  ;;  %v372_v45 = vld [vmem:[%s1992_s9 + $0x68] sm:$0xff] }
 0x228   : > { %v610_v50 = vmul.f32 1.442695, %v593_v48  ;;  %v612_v51 = vmul.f32 1.442695, %v594_v49  ;;  %v373_v49 = vld [vmem:[%s1992_s9 + $0x70] sm:$0xff] }
 0x229   : > { %v567_v53 = vpop.xlane.xlu1 %566  ;;  %v569_v54 = vpop.xlane.xlu0 %568 }
 0x22a   : > { %1366 = vpow2.f32 %v610_v50  ;;  %v595_v55 = vsub.f32 %v1928_v63, %v567_v53  ;;  %v596_v56 = vsub.f32 %v1932_v0, %v569_v54  ;;  %v374_v50 = vld [vmem:[%s1992_s9 + $0x78] sm:$0xff] }
 0x22b   : > { %1368 = vpow2.f32 %v612_v51  ;;  %v1283_v51 = vpack.c.bf16 %v374_v50, %v373_v49 }
 0x22c   : > { %v614_v59 = vmul.f32 1.442695, %v595_v55  ;;  %v616_v52 = vmul.f32 1.442695, %v596_v56 }
 0x22d   : > { %v571_v60 = vpop.xlane.xlu1 %570  ;;  %v573_v61 = vpop.xlane.xlu0 %572 }
 0x22e   : > { %1370 = vpow2.f32 %v614_v59  ;;  %v597_v62 = vsub.f32 %v1938_v5, %v571_v60  ;;  %v598_v57 = vsub.f32 %v1942_v6, %v573_v61 }
 0x22f   : > { %1372 = vpow2.f32 %v616_v52 }
 0x230   : > { %v2009_v58 = vpop.eup %1364  ;;  %v618_v1 = vmul.f32 1.442695, %v597_v62  ;;  %v620_v2 = vmul.f32 1.442695, %v598_v57 }
 0x231   : > { %v575_v3 = vpop.xlane.xlu1 %574  ;;  %v577_v4 = vpop.xlane.xlu0 %576  ;;  %640 = vadd.xlane.f32.xlu0 %v2009_v58 }
 0x232   : > { %1374 = vpow2.f32 %v618_v1  ;;  %v599_v63 = vsub.f32 %v1948_v11, %v575_v3  ;;  %v600_v0 = vsub.f32 %v1952_v12, %v577_v4 }
 0x233   : > { %1376 = vpow2.f32 %v620_v2 }
 0x234   : > { %v2014_v7 = vpop.eup %1366  ;;  %v622_v5 = vmul.f32 1.442695, %v599_v63  ;;  %v624_v8 = vmul.f32 1.442695, %v600_v0 }
 0x235   : > { %v2016_v6 = vpop.eup %1368  ;;  %v579_v9 = vpop.xlane.xlu1 %578  ;;  %642 = vadd.xlane.f32.xlu1 %v2014_v7 }
 0x236   : > { %v581_v10 = vpop.xlane.xlu0 %580  ;;  %1378 = vpow2.f32 %v622_v5  ;;  %v601_v13 = vsub.f32 %v1958_v17, %v579_v9  ;;  %644 = vadd.xlane.f32.xlu0 %v2016_v6 }
 0x237   : > { %v602_v14 = vsub.f32 %v1962_v18, %v581_v10  ;;  %1380 = vpow2.f32 %v624_v8 }
 0x238   : > { %v2022_v11 = vpop.eup %1370  ;;  %v626_v12 = vmul.f32 1.442695, %v601_v13 }
 0x239   : > { %v628_v15 = vmul.f32 1.442695, %v602_v14  ;;  %v2024_v16 = vpop.eup %1372  ;;  %v583_v19 = vpop.xlane.xlu1 %582  ;;  %646 = vadd.xlane.f32.xlu1 %v2022_v11 }
 0x23a   : > { %v585_v20 = vpop.xlane.xlu0 %584  ;;  %1382 = vpow2.f32 %v626_v12  ;;  %v603_v21 = vsub.f32 %v1968_v23, %v583_v19  ;;  %648 = vadd.xlane.f32.xlu0 %v2024_v16 }
 0x23b   : > { %v604_v17 = vsub.f32 %v1972_v24, %v585_v20  ;;  %1384 = vpow2.f32 %v628_v15  ;;  %v367_v24 = vld [vmem:[%s1992_s9 + $0x40] sm:$0xff] }
 0x23c   : > { %v2030_v18 = vpop.eup %1374  ;;  %v630_v22 = vmul.f32 1.442695, %v603_v21  ;;  %v1271_v34 = vpack.c.bf16 %v368_v33, %v367_v24 }
 0x23d   : > { %v632_v25 = vmul.f32 1.442695, %v604_v17  ;;  %v2032_v26 = vpop.eup %1376  ;;  %v587_v27 = vpop.xlane.xlu1 %586  ;;  %650 = vadd.xlane.f32.xlu1 %v2030_v18 }
 0x23e   : > { %v589_v31 = vpop.xlane.xlu0 %588  ;;  %1386 = vpow2.f32 %v630_v22  ;;  %v605_v32 = vsub.f32 %v1978_v28, %v587_v27  ;;  %652 = vadd.xlane.f32.xlu0 %v2032_v26  ;;  %1272 = vmatprep.subr.bf16.mxu1 %v1271_v34 }
 0x23f   : > { %v606_v23 = vsub.f32 %v1982_v29, %v589_v31  ;;  %1388 = vpow2.f32 %v632_v25  ;;  %1274 = vmatpush3.bf16.msra.mxu1 %v1271_v34  ;;  %v369_v29 = vld [vmem:[%s1992_s9 + $0x50] sm:$0xff] }
 0x240   : > { %v2040_v35 = vpop.eup %1378  ;;  %v634_v36 = vmul.f32 1.442695, %v605_v32  ;;  %v1275_v41 = vpack.c.bf16 %v370_v40, %v369_v29 }
 0x241   : > { %v636_v37 = vmul.f32 1.442695, %v606_v23  ;;  %v2042_v38 = vpop.eup %1380  ;;  %654 = vadd.xlane.f32.xlu1 %v2040_v35  ;;  %v591_v39 = vpop.xlane.xlu1 %590 }
 0x242   : > { %1390 = vpow2.f32 %v634_v36  ;;  %v607_v28 = vsub.f32 %v1988_v30, %v591_v39  ;;  %656 = vadd.xlane.f32.xlu0 %v2042_v38  ;;  %1276 = vmatprep.subr.bf16.mxu1 %v1275_v41  ;;  %v371_v30 = vld [vmem:[%s1992_s9 + $0x60] sm:$0xff] }
 0x243   : > { %1392 = vpow2.f32 %v636_v37  ;;  %1278 = vmatpush3.bf16.msra.mxu1 %v1275_v41  ;;  %v1279_v46 = vpack.c.bf16 %v372_v45, %v371_v30 }
 0x244   : > { %v2049_v42 = vpop.eup %1382  ;;  %v638_v43 = vmul.f32 1.442695, %v607_v28 }
 0x245   : > { %v2051_v44 = vpop.eup %1384  ;;  %658 = vadd.xlane.f32.xlu1 %v2049_v42  ;;  %1280 = vmatprep.subr.bf16.mxu1 %v1279_v46 }
 0x246   : > { %1394 = vpow2.f32 %v638_v43  ;;  %660 = vadd.xlane.f32.xlu0 %v2051_v44 }
 0x247   : > { %1282 = vmatpush3.bf16.msra.mxu1 %v1279_v46 }
 0x248   : > { %v2057_v47 = vpop.eup %1386  ;;  %1284 = vmatprep.subr.bf16.mxu1 %v1283_v51 }
 0x249   : > { %v2059_v48 = vpop.eup %1388  ;;  %662 = vadd.xlane.f32.xlu1 %v2057_v47 }
 0x24a   : > { %664 = vadd.xlane.f32.xlu0 %v2059_v48 }
 0x24b   : > { %1286 = vmatpush3.bf16.msra.mxu1 %v1283_v51 }
 0x24c   : > { %v2065_v53 = vpop.eup %1390 }
 0x24d   : > { %v2067_v54 = vpop.eup %1392  ;;  %666 = vadd.xlane.f32.xlu1 %v2065_v53 }
 0x24e   : > { %668 = vadd.xlane.f32.xlu0 %v2067_v54 }
 0x250   : > { %v2071_v55 = vpop.eup %1394 }
 0x251   : > { %670 = vadd.xlane.f32.xlu1 %v2071_v55 }
 0x2be   : > { %v641_v56 = vpop.xlane.xlu0 %640 }
 0x2bf   : > { %1396 = vrcp.f32 %v641_v56 }
 0x2c2   : > { %v643_v59 = vpop.xlane.xlu1 %642 }
 0x2c3   : > { %1398 = vrcp.f32 %v643_v59  ;;  %v645_v52 = vpop.xlane.xlu0 %644 }
 0x2c4   : > { %1400 = vrcp.f32 %v645_v52 }
 0x2c6   : > { %v647_v60 = vpop.xlane.xlu1 %646 }
 0x2c7   : > { %1402 = vrcp.f32 %v647_v60  ;;  %v649_v61 = vpop.xlane.xlu0 %648 }
 0x2c8   : > { %1404 = vrcp.f32 %v649_v61 }
 0x2c9   : > { %v1397_v62 = vpop.eup %1396 }
 0x2ca   : > { %v651_v57 = vpop.xlane.xlu1 %650  ;;  %v673_v1 = vmul.f32 %v1397_v62, %v2009_v58 }
 0x2cb   : > { %1406 = vrcp.f32 %v651_v57  ;;  %v653_v2 = vpop.xlane.xlu0 %652 }
 0x2cc   : > { %1408 = vrcp.f32 %v653_v2  ;;  %1199 = vmatprep.mubr.f32.mxu1 %v673_v1 }
 0x2cd   : > { %v1399_v3 = vpop.eup %1398 }
 0x2ce   : > { %v1401_v4 = vpop.eup %1400  ;;  %v655_v63 = vpop.xlane.xlu1 %654  ;;  %v675_v0 = vmul.f32 %v1399_v3, %v2014_v7 }
 0x2cf   : > { %1410 = vrcp.f32 %v655_v63  ;;  %v657_v5 = vpop.xlane.xlu0 %656  ;;  %v677_v8 = vmul.f32 %v1401_v4, %v2016_v6 }
 0x2d0   : > { %1412 = vrcp.f32 %v657_v5  ;;  %1200 = vmatmul.mubr.f32.vlgmr.msra.gmra.mrb[0].mxu1 %v675_v0 }
 0x2d1   : > { %v1403_v9 = vpop.eup %1402  ;;  %1202 = vmatprep.mubr.f32.mxu1 %v677_v8 }
 0x2d2   : > { %v1405_v10 = vpop.eup %1404  ;;  %v659_v13 = vpop.xlane.xlu1 %658  ;;  %v679_v58 = vmul.f32 %v1403_v9, %v2022_v11 }
 0x2d3   : > { %1414 = vrcp.f32 %v659_v13  ;;  %v661_v14 = vpop.xlane.xlu0 %660  ;;  %v681_v12 = vmul.f32 %v1405_v10, %v2024_v16 }
 0x2d4   : > { %1416 = vrcp.f32 %v661_v14  ;;  %1203 = vmatmul.mubr.f32.gmra.mrb[2].mxu1 %v679_v58 }
 0x2d5   : > { %v1407_v15 = vpop.eup %1406  ;;  %1205 = vmatprep.mubr.f32.mxu1 %v681_v12 }
 0x2d6   : > { %v1409_v7 = vpop.eup %1408  ;;  %v663_v19 = vpop.xlane.xlu1 %662  ;;  %v683_v6 = vmul.f32 %v1407_v15, %v2030_v18 }
 0x2d7   : > { %1418 = vrcp.f32 %v663_v19  ;;  %v665_v20 = vpop.xlane.xlu0 %664  ;;  %v685_v21 = vmul.f32 %v1409_v7, %v2032_v26 }
 0x2d8   : > { %1420 = vrcp.f32 %v665_v20  ;;  %1206 = vmatmul.mubr.f32.gmra.mrb[4].mxu1 %v683_v6 }
 0x2d9   : > { %v1411_v17 = vpop.eup %1410  ;;  %1208 = vmatprep.mubr.f32.mxu1 %v685_v21 }
 0x2da   : > { %v1413_v11 = vpop.eup %1412  ;;  %v667_v22 = vpop.xlane.xlu1 %666  ;;  %v687_v16 = vmul.f32 %v1411_v17, %v2040_v35 }
 0x2db   : > { %1422 = vrcp.f32 %v667_v22  ;;  %v669_v25 = vpop.xlane.xlu0 %668  ;;  %v689_v27 = vmul.f32 %v1413_v11, %v2042_v38 }
 0x2dc   : > { %1424 = vrcp.f32 %v669_v25  ;;  %1209 = vmatmul.mubr.f32.gmra.mrb[6].mxu1 %v687_v16 }
 0x2dd   : > { %v1415_v31 = vpop.eup %1414  ;;  %1211 = vmatprep.mubr.f32.mxu1 %v689_v27 }
 0x2de   : > { %v1417_v18 = vpop.eup %1416  ;;  %v671_v32 = vpop.xlane.xlu1 %670  ;;  %v691_v26 = vmul.f32 %v1415_v31, %v2049_v42 }
 0x2df   : > { %1426 = vrcp.f32 %v671_v32  ;;  %v693_v23 = vmul.f32 %v1417_v18, %v2051_v44 }
 0x2e0   : > { %1212 = vmatmul.mubr.f32.gmra.mrb[8].mxu1 %v691_v26 }
 0x2e1   : > { %v1419_v24 = vpop.eup %1418  ;;  %1214 = vmatprep.mubr.f32.mxu1 %v693_v23 }
 0x2e2   : > { %v1421_v33 = vpop.eup %1420  ;;  %v695_v34 = vmul.f32 %v1419_v24, %v2057_v47 }
 0x2e3   : > { %v697_v35 = vmul.f32 %v1421_v33, %v2059_v48 }
 0x2e4   : > { %1215 = vmatmul.mubr.f32.gmra.mrb[10].mxu1 %v695_v34 }
 0x2e5   : > { %v1423_v36 = vpop.eup %1422  ;;  %1217 = vmatprep.mubr.f32.mxu1 %v697_v35 }
 0x2e6   : > { %v1425_v37 = vpop.eup %1424  ;;  %v699_v38 = vmul.f32 %v1423_v36, %v2065_v53 }
 0x2e7   : > { %v701_v39 = vmul.f32 %v1425_v37, %v2067_v54 }
 0x2e8   : > { %1218 = vmatmul.mubr.f32.gmra.mrb[12].mxu1 %v699_v38 }
 0x2e9   : > { %v1427_v28 = vpop.eup %1426  ;;  %1220 = vmatprep.mubr.f32.mxu1 %v701_v39 }
 0x2ea   : > { %v703_v29 = vmul.f32 %v1427_v28, %v2071_v55 }
 0x2ec   : > { %1221 = vmatmul.mubr.f32.gmra.mrb[14].mxu1 %v703_v29 }
 0x3a3   : > { %v1201_v40 = vpop.f32.mrb[0].mxu1 }
 0x3a4   : > { %850 = vst [vmem:[%s2091_s5 + $0x8] sm:$0xff] %v1201_v40  ;;  %v770_v41 = vpop.f32.mrb[1].mxu1 }
 0x3a5   : > { %849 = vst [vmem:[%s2091_s5] sm:$0xff] %v770_v41 }
 0x3a7   : > { %v1204_v42 = vpop.f32.mrb[2].mxu1 }
 0x3a8   : > { %852 = vst [vmem:[%s2091_s5 + $0x18] sm:$0xff] %v1204_v42  ;;  %v780_v43 = vpop.f32.mrb[3].mxu1 }
 0x3a9   : > { %851 = vst [vmem:[%s2091_s5 + $0x10] sm:$0xff] %v780_v43 }
 0x3ab   : > { %v1207_v44 = vpop.f32.mrb[4].mxu1 }
 0x3ac   : > { %854 = vst [vmem:[%s2091_s5 + $0x28] sm:$0xff] %v1207_v44  ;;  %v790_v30 = vpop.f32.mrb[5].mxu1 }
 0x3ad   : > { %853 = vst [vmem:[%s2091_s5 + $0x20] sm:$0xff] %v790_v30 }
 0x3af   : > { %v1210_v45 = vpop.f32.mrb[6].mxu1 }
 0x3b0   : > { %856 = vst [vmem:[%s2091_s5 + $0x38] sm:$0xff] %v1210_v45  ;;  %v800_v46 = vpop.f32.mrb[7].mxu1 }
 0x3b1   : > { %855 = vst [vmem:[%s2091_s5 + $0x30] sm:$0xff] %v800_v46 }
 0x3b3   : > { %v1213_v47 = vpop.f32.mrb[8].mxu1 }
 0x3b4   : > { %858 = vst [vmem:[%s2091_s5 + $0x48] sm:$0xff] %v1213_v47  ;;  %v810_v48 = vpop.f32.mrb[9].mxu1 }
 0x3b5   : > { %857 = vst [vmem:[%s2091_s5 + $0x40] sm:$0xff] %v810_v48 }
 0x3b7   : > { %v1216_v49 = vpop.f32.mrb[10].mxu1 }
 0x3b8   : > { %860 = vst [vmem:[%s2091_s5 + $0x58] sm:$0xff] %v1216_v49  ;;  %v820_v50 = vpop.f32.mrb[11].mxu1 }
 0x3b9   : > { %859 = vst [vmem:[%s2091_s5 + $0x50] sm:$0xff] %v820_v50 }
 0x3bb   : > { %v1219_v51 = vpop.f32.mrb[12].mxu1 }
 0x3bc   : > { %862 = vst [vmem:[%s2091_s5 + $0x68] sm:$0xff] %v1219_v51  ;;  %v830_v53 = vpop.f32.mrb[13].mxu1 }
 0x3bd   : > { %861 = vst [vmem:[%s2091_s5 + $0x60] sm:$0xff] %v830_v53 }
 0x3bf   : > { %v1222_v54 = vpop.f32.mrb[14].mxu1 }
 0x3c0   : > { %864 = vst [vmem:[%s2091_s5 + $0x78] sm:$0xff] %v1222_v54  ;;  %v840_v55 = vpop.f32.mrb[15].mxu1 }
 0x3c1   : > { %863 = vst [vmem:[%s2091_s5 + $0x70] sm:$0xff] %v840_v55 }
 0x3c2   : > { %1531 = shalt.err (!%p1528_p11)
}
 0x3c3   : > { %s1532_s8 = scalar_lea.hbm %s2112_s1, 2048  ;;  %s1536_s24 = scalar_lea.hbm %s2169_s4, 4096 }
 0x3c4   : > { %p1533_p2 = scmp.ne.s32.totalorder %s2112_s1, %s1532_s8  ;;  %p1537_p4 = scmp.lt.u32.totalorder %s2112_s1, %s2169_s4 }
 0x3c5   : > { %p1538_p3 = scmp.lt.u32.totalorder %s1536_s24, %s1532_s8  ;;  %p1540_p10 = scmp.lt.u32.totalorder %s1532_s8, %s2112_s1 }
 0x3c6   : > { %p1534_p5 = pnand %p1533_p2, %p2201_p8 }
 0x3c7   : > { %p1539_p0 = por %p1538_p3, %p1537_p4 }
 0x3c8   : > { %p1535_p7 = pneg %p1534_p5 }
 0x3c9   : > { %p1541_p9 = por %p1540_p10, %p1539_p0 }
 0x3cb   : > { %p1542_p12 = pnand %p1541_p9, %p1535_p7 }
 0x3cd   : > { %1545 = shalt.err (!%p1542_p12)
}
 0x3ce   : > { %s1613_s27 = smov 128   ;;  %s1614_s19 = smov 8  }
 0x3cf   : > { %1293 = dma.vmem_to_hbm [thread:$0]  (%p2201_p8), %s2114_s11, 2048, %s2112_s1, %s866_s23, %s1613_s27, %s1613_s27, %s1614_s19  }
 0x3d0 PF: > { %s2202_s29 = sld [smem:[#allocation13_spill]]  ;;  %s896_s9 = sand.u32 1, %s1584_s15  }
 0x3d1   : > { %p2203_p1 = scmp.ne.s32.totalorder %s2189_s30, 0  ;;  %s897_s5 = scalar_lea.sflag [#allocation4], %s896_s9 }
 0x3d6   : > { %p2204_p6 = scmp.ge.s32.totalorder %s2202_s29, 2 }
 0x3d8   : > { %p1306_p13 = pnand %p2204_p6, %p2203_p1 }
 0x3da   : > { %1579 = dma.done.wait (!%p1306_p13), %s897_s5, 2048  }
 0x3db   : > { %1581 = vsyncadd (!%p1306_p13), %s897_s5, 4294965248  ;;  %s23_s20 = sadd.s32 1, %s2202_s29   ;;  %s2205_s7 = sld [smem:[#allocation15_spill]] }
 0x3dc   : > { %p20_p11 = scmp.ge.s32.totalorder %s23_s20, 4   ;;  %s2206_s18 = sld [smem:[#allocation12_spill]] }
 0x3dd   : > { %s2207_s19 = sld [smem:[#allocation14_spill]]  ;;  %s2208_s15 = smov %s1588_s16 }
 0x3de   : > { %s2209_s16 = smov %s1592_s17  ;;  %22 = sbr.rel (!%p20_p11) target bundleno = 10 (0xa), region = 108 }
 0x3e1   : > { %s2210_s17 = smov %s2205_s7 }
 0x3e5   :  { %902 = vsyncpa [#allocation3], 1 }
 0x3e6   :  { %904 = vsyncpa [#allocation3 + $0x1], 1 }
 0x3e7   :  { %905 = vsyncpa [#allocation6], 1 }
 0x3e8   :  { %907 = vsyncpa [#allocation6 + $0x1], 1 }
 0x3e9   :  { %908 = vsyncpa [#allocation4], 1 }
 0x3ea   :  { %910 = vsyncpa [#allocation4 + $0x1], 1 }

</bundles_post_ra>
